<compile_context>
chip_gen: v7x
topology: tpu7x:2x2x1
jax: 0.10.0
libtpu: 0.0.40
codegen_flags: <defaults>
</compile_context>

<pallas_src>
import functools

import jax
import jax.numpy as jnp
from jax.experimental import pallas as pl
from jax.experimental.pallas import tpu as pltpu

MXU_DTYPE = jnp.bfloat16   # MXU-native operand dtype; accumulation stays f32.
_CH_ALIGN = 16             # channel padding so sublane concats stay tile-aligned.


def _relu6(v):
    return jnp.clip(v, 0.0, 6.0)


def _round_up(v, m):
    return (v + m - 1) // m * m


# ----------------------------------------------------------------------------
# Kernels
# ----------------------------------------------------------------------------

def _convblock_same_kernel(xm_ref, xh_ref, w1_ref, b1_ref, w2_ref, b2_ref, o_ref,
                           *, l_valid):
    """One (batch, L-tile) grid step of the stride-1 ConvBlock.

    xm_ref: (Cp, TL)     main tile of xA (xA[q] = xpad[q - 2], xpad = pad(x, 2))
    xh_ref: (Cp, 8)      right halo of the window
    w1_ref: (Cp, 5*Cp)   BN-folded conv1 weight, tap-major columns, MXU_DTYPE
    w2_ref: (Cp, 5*Cp)   BN-folded conv2 weight, MXU_DTYPE
    b1_ref, b2_ref: (Cp, 1) f32 folded biases
    o_ref : (Cp, TL)
    """
    l = pl.program_id(1)
    _, tl = o_ref.shape
    th = tl + 4                                   # conv1 evaluated on a 2-halo'd range

    # Window xA[l*TL : l*TL + TL + 8]; cast once to bf16 for the MXU.
    xwin = jnp.concatenate([xm_ref[...], xh_ref[...]], axis=1)       # (Cp, TL+8)
    xwin_m = xwin.astype(MXU_DTYPE)

    # conv1 (+ folded BN1) as a single MXU matmul: im2col of the 5 taps along
    # sublanes -> contraction dim 5*Cp instead of Cp.
    rhs1 = jnp.concatenate([xwin_m[:, k:k + th] for k in range(5)], axis=0)
    h1 = jnp.dot(w1_ref[...], rhs1, preferred_element_type=jnp.float32)
    h1 = _relu6(h1 + b1_ref[...])

    # conv2's zero padding: zero the columns outside the valid feature map
    # (replaces the old hpad VMEM scratch round trip).
    g = l * tl - 2 + jax.lax.broadcasted_iota(jnp.int32, (1, th), 1)
    h1 = jnp.where((g >= 0) & (g < l_valid), h1, 0.0)
    h1_m = h1.astype(MXU_DTYPE)

    # conv2 (+ folded BN2), again one fused matmul.
    rhs2 = jnp.concatenate([h1_m[:, k:k + tl] for k in range(5)], axis=0)
    h2 = jnp.dot(w2_ref[...], rhs2, preferred_element_type=jnp.float32)
    h2 = _relu6(h2 + b2_ref[...])

    identity = xwin[:, 4:4 + tl].astype(jnp.float32)    # x[:, l*TL : l*TL+TL]
    o_ref[...] = (h2 + identity).astype(o_ref.dtype)


def _convblock_expand_kernel(xem_ref, xeh_ref, xom_ref, xoh_ref,
                             w1_ref, b1_ref, w2_ref, b2_ref, wp_ref, bp_ref,
                             o_ref, *, l_valid):
    """One (batch, L-tile) grid step of the ch_expand ConvBlock (conv1 stride 2).

    xem/xom: (Cin_p, T1) even/odd main tiles of xA (xA[q] = xpad[q - 4]).
    xeh/xoh: (Cin_p, 6)  right halos.
    wp_ref : (Cout_p, Cin_p) 1x1 projection weight, MXU_DTYPE.
    o_ref  : (Cout_p, T1)
    """
    l = pl.program_id(1)
    _, t1 = o_ref.shape
    th = t1 + 4

    xe = jnp.concatenate([xem_ref[...], xeh_ref[...]], axis=1)       # (Cin_p, T1+6)
    xo = jnp.concatenate([xom_ref[...], xoh_ref[...]], axis=1)
    xe_m = xe.astype(MXU_DTYPE)
    xo_m = xo.astype(MXU_DTYPE)

    # conv1 (k=5, stride 2): taps map to contiguous slices of the even/odd streams.
    rhs1 = jnp.concatenate(
        [xe_m[:, 0:th], xo_m[:, 0:th], xe_m[:, 1:1 + th],
         xo_m[:, 1:1 + th], xe_m[:, 2:2 + th]], axis=0)
    h1 = jnp.dot(w1_ref[...], rhs1, preferred_element_type=jnp.float32)
    h1 = _relu6(h1 + b1_ref[...])

    g = l * t1 - 2 + jax.lax.broadcasted_iota(jnp.int32, (1, th), 1)
    h1 = jnp.where((g >= 0) & (g < l_valid), h1, 0.0)
    h1_m = h1.astype(MXU_DTYPE)

    rhs2 = jnp.concatenate([h1_m[:, k:k + t1] for k in range(5)], axis=0)
    h2 = jnp.dot(w2_ref[...], rhs2, preferred_element_type=jnp.float32)
    h2 = _relu6(h2 + b2_ref[...])

    # 1x1 stride-2 projection residual: x[:, 2t] = xeA[t + 3].
    ident = jnp.dot(wp_ref[...], xe_m[:, 3:3 + t1],
                    preferred_element_type=jnp.float32) + bp_ref[...]
    o_ref[...] = (h2 + ident).astype(o_ref.dtype)


# ----------------------------------------------------------------------------
# Wrapper
# ----------------------------------------------------------------------------

def _fold_bn_fused(w, b, gamma, beta, mean, var, eps, c_out_p, c_in_p):
    """Fold inference BatchNorm1d into the conv, pad channels and reshape to a
    tap-major (c_out_p, K*c_in_p) MXU weight + (c_out_p, 1) f32 bias."""
    c_out, c_in, k = w.shape
    scale = gamma / jnp.sqrt(var + eps)
    w_f = w * scale[:, None, None]
    b_f = (b - mean) * scale + beta
    w_f = jnp.pad(w_f, ((0, c_out_p - c_out), (0, c_in_p - c_in), (0, 0)))
    b_f = jnp.pad(b_f, ((0, c_out_p - c_out),))
    w_fused = jnp.transpose(w_f, (0, 2, 1)).reshape(c_out_p, k * c_in_p)
    return w_fused.astype(MXU_DTYPE), b_f.astype(jnp.float32)[:, None]


def _pick_tile(l_out, max_tile):
    if l_out <= max_tile:
        return l_out                         # single, full-extent tile
    assert max_tile % 128 == 0, "max_tile must be a multiple of 128"
    return max_tile


def conv_block(x, params, ch_expand, *, bn_eps=1e-5, max_tile=1024):
    """Pallas implementation of ConvBlock.forward (inference-mode BatchNorm)."""
    assert x.ndim == 3, "input must be [B, C, L]"
    B, C_in, L = x.shape
    C_out = 2 * C_in if ch_expand else C_in
    cp_in = _round_up(C_in, _CH_ALIGN)
    cp_out = _round_up(C_out, _CH_ALIGN)

    w1f, b1f = _fold_bn_fused(params["w1"], params["b1"], params["g1"], params["be1"],
                              params["m1"], params["v1"], bn_eps, cp_out, cp_in)
    w2f, b2f = _fold_bn_fused(params["w2"], params["b2"], params["g2"], params["be2"],
                              params["m2"], params["v2"], bn_eps, cp_out, cp_out)

    compiler_params = pltpu.CompilerParams(
        # Batch and L-tile axes are fully independent -> shard across TCs on v7x.
        dimension_semantics=("parallel", "parallel"),
        # Explicit VMEM budget: within v7x's 64 MiB and raises v5e's 16 MiB default.
        vmem_limit_bytes=32 * 1024 * 1024,
    )

    if not ch_expand:
        l_out = L                                    # k=5, stride 1, pad 2
        tl = _pick_tile(l_out, max_tile)
        num_l = -(-l_out // tl)
        l_main = num_l * tl
        halo = 8
        # xA[q] = xpad[q - 2]; channels zero-padded to cp_in; length l_main + halo.
        x_a = jnp.pad(x, ((0, 0), (0, cp_in - C_in), (4, l_main + halo - 4 - L)))
        x_main = x_a[:, :, :l_main]
        hidx = (jnp.arange(num_l)[:, None] + 1) * tl + jnp.arange(halo)[None, :]
        x_halo = jnp.transpose(x_a[:, :, hidx], (0, 2, 1, 3))   # (B, num_l, cp_in, 8)

        kernel = functools.partial(_convblock_same_kernel, l_valid=l_out)
        out = pl.pallas_call(
            kernel,
            out_shape=jax.ShapeDtypeStruct((B, cp_out, l_main), x.dtype),
            grid=(B, num_l),
            in_specs=[
                # (If profiles show exposed input DMA, add pipeline_mode=pl.Buffered(3).)
                pl.BlockSpec((None, cp_in, tl), lambda b, l: (b, 0, l)),
                pl.BlockSpec((None, None, cp_in, halo), lambda b, l: (b, l, 0, 0)),
                pl.BlockSpec((cp_out, 5 * cp_in), lambda b, l: (0, 0)),
                pl.BlockSpec((cp_out, 1), lambda b, l: (0, 0)),
                pl.BlockSpec((cp_out, 5 * cp_out), lambda b, l: (0, 0)),
                pl.BlockSpec((cp_out, 1), lambda b, l: (0, 0)),
            ],
            out_specs=pl.BlockSpec((None, cp_out, tl), lambda b, l: (b, 0, l)),
            compiler_params=compiler_params,
        )(x_main, x_halo, w1f, b1f, w2f, b2f)
        return out[:, :C_out, :l_out]

    # ch_expand=True ----------------------------------------------------------
    l1 = (L + 2 * 2 - 5) // 2 + 1                   # k=5, stride 2, pad 2
    t1 = _pick_tile(l1, max_tile)
    num_l = -(-l1 // t1)
    l1_main = num_l * t1
    halo = 6
    # xA[q] = xpad[q - 4]; even/odd de-interleave keeps every stride-2 access
    # contiguous inside the kernel.
    x_a = jnp.pad(x, ((0, 0), (0, cp_in - C_in), (6, 2 * (l1_main + halo) - 6 - L)))
    xe = x_a[:, :, 0::2]                            # xeA[u] = xpad[2u - 4]
    xo = x_a[:, :, 1::2]                            # xoA[u] = xpad[2u - 3]
    xe_main = xe[:, :, :l1_main]
    xo_main = xo[:, :, :l1_main]
    hidx = (jnp.arange(num_l)[:, None] + 1) * t1 + jnp.arange(halo)[None, :]
    xe_halo = jnp.transpose(xe[:, :, hidx], (0, 2, 1, 3))        # (B, num_l, cp_in, 6)
    xo_halo = jnp.transpose(xo[:, :, hidx], (0, 2, 1, 3))

    wp = jnp.pad(params["wp"][:, :, 0], ((0, cp_out - C_out), (0, cp_in - C_in)))
    wp = wp.astype(MXU_DTYPE)
    bp = jnp.pad(params["bp"], ((0, cp_out - C_out),)).astype(jnp.float32)[:, None]

    kernel = functools.partial(_convblock_expand_kernel, l_valid=l1)
    out = pl.pallas_call(
        kernel,
        out_shape=jax.ShapeDtypeStruct((B, cp_out, l1_main), x.dtype),
        grid=(B, num_l),
        in_specs=[
            pl.BlockSpec((None, cp_in, t1), lambda b, l: (b, 0, l)),
            pl.BlockSpec((None, None, cp_in, halo), lambda b, l: (b, l, 0, 0)),
            pl.BlockSpec((None, cp_in, t1), lambda b, l: (b, 0, l)),
            pl.BlockSpec((None, None, cp_in, halo), lambda b, l: (b, l, 0, 0)),
            pl.BlockSpec((cp_out, 5 * cp_in), lambda b, l: (0, 0)),
            pl.BlockSpec((cp_out, 1), lambda b, l: (0, 0)),
            pl.BlockSpec((cp_out, 5 * cp_out), lambda b, l: (0, 0)),
            pl.BlockSpec((cp_out, 1), lambda b, l: (0, 0)),
            pl.BlockSpec((cp_out, cp_in), lambda b, l: (0, 0)),
            pl.BlockSpec((cp_out, 1), lambda b, l: (0, 0)),
        ],
        out_specs=pl.BlockSpec((None, cp_out, t1), lambda b, l: (b, 0, l)),
        compiler_params=compiler_params,
    )(xe_main, xe_halo, xo_main, xo_halo, w1f, b1f, w2f, b2f, wp, bp)
    return out[:, :C_out, :l1]


# ----------------------------------------------------------------------------
# References and self-test
# ----------------------------------------------------------------------------

def _reference(x, params, ch_expand, bn_eps=1e-5):
    """Pure-JAX reference of ConvBlock.forward (inference-mode BatchNorm, f32)."""
    prec = jax.lax.Precision.HIGHEST

    def conv1d(v, w, b, stride, pad):
        y = jax.lax.conv_general_dilated(
            v, w, window_strides=(stride,), padding=[(pad, pad)],
            dimension_numbers=("NCH", "OIH", "NCH"), precision=prec)
        return y + b[None, :, None]

    def bn(v, gamma, beta, mean, var):
        s = gamma / jnp.sqrt(var + bn_eps)
        return (v - mean[None, :, None]) * s[None, :, None] + beta[None, :, None]

    identity = x
    stride = 2 if ch_expand else 1
    h = conv1d(x, params["w1"], params["b1"], stride, 2)
    h = _relu6(bn(h, params["g1"], params["be1"], params["m1"], params["v1"]))
    h = conv1d(h, params["w2"], params["b2"], 1, 2)
    h = _relu6(bn(h, params["g2"], params["be2"], params["m2"], params["v2"]))
    if ch_expand:
        identity = conv1d(x, params["wp"], params["bp"], 2, 0)
    return h + identity


def _reference_folded(x, params, ch_expand, bn_eps=1e-5):
    """Mirrors the kernel's numerics exactly: BN folded into the convs, MXU
    operands rounded to MXU_DTYPE, f32 accumulation and f32 epilogue."""
    prec = jax.lax.Precision.HIGHEST
    q = lambda a: a.astype(MXU_DTYPE).astype(jnp.float32)

    def conv1d(v, w, b, stride, pad):
        y = jax.lax.conv_general_dilated(
            v, w, window_strides=(stride,), padding=[(pad, pad)],
            dimension_numbers=("NCH", "OIH", "NCH"), precision=prec)
        return y + b[None, :, None]

    def fold(w, b, gamma, beta, mean, var):
        s = gamma / jnp.sqrt(var + bn_eps)
        return q(w * s[:, None, None]), ((b - mean) * s + beta).astype(jnp.float32)

    w1, b1 = fold(params["w1"], params["b1"], params["g1"], params["be1"],
                  params["m1"], params["v1"])
    w2, b2 = fold(params["w2"], params["b2"], params["g2"], params["be2"],
                  params["m2"], params["v2"])
    xq = q(x)
    stride = 2 if ch_expand else 1
    h = _relu6(conv1d(xq, w1, b1, stride, 2))
    h = _relu6(conv1d(q(h), w2, b2, 1, 2))
    if ch_expand:
        identity = conv1d(xq, q(params["wp"]), params["bp"].astype(jnp.float32), 2, 0)
    else:
        identity = x.astype(jnp.float32)
    return h + identity


def _make_params(key, c_in, c_out, with_proj):
    ks = jax.random.split(key, 14)
    p = {
        "w1": 0.3 * jax.random.normal(ks[0], (c_out, c_in, 5), jnp.float32),
        "b1": 0.1 * jax.random.normal(ks[1], (c_out,), jnp.float32),
        "g1": 1.0 + 0.1 * jax.random.normal(ks[2], (c_out,), jnp.float32),
        "be1": 0.1 * jax.random.normal(ks[3], (c_out,), jnp.float32),
        "m1": 0.1 * jax.random.normal(ks[4], (c_out,), jnp.float32),
        "v1": jax.random.uniform(ks[5], (c_out,), jnp.float32, 0.5, 1.5),
        "w2": 0.3 * jax.random.normal(ks[6], (c_out, c_out, 5), jnp.float32),
        "b2": 0.1 * jax.random.normal(ks[7], (c_out,), jnp.float32),
        "g2": 1.0 + 0.1 * jax.random.normal(ks[8], (c_out,), jnp.float32),
        "be2": 0.1 * jax.random.normal(ks[9], (c_out,), jnp.float32),
        "m2": 0.1 * jax.random.normal(ks[10], (c_out,), jnp.float32),
        "v2": jax.random.uniform(ks[11], (c_out,), jnp.float32, 0.5, 1.5),
    }
    if with_proj:
        p["wp"] = 0.3 * jax.random.normal(ks[12], (c_out, c_in, 1), jnp.float32)
        p["bp"] = 0.1 * jax.random.normal(ks[13], (c_out,), jnp.float32)
    return p


def _check(name, y, ref, tol):
    assert y.shape == ref.shape, (name, y.shape, ref.shape)
    err = float(jnp.max(jnp.abs(y - ref)))
    assert err < tol, (name, err)


if __name__ == "__main__":
    key = jax.random.PRNGKey(0)
    kx, k1, k2, k3 = jax.random.split(key, 4)

    # Small shapes consistent with the module: [B, C, L] = [2, 4, 16].
    B, C_in, L = 2, 4, 16
    x = jax.random.normal(kx, (B, C_in, L), dtype=jnp.float32)

    # ch_expand=False: stride-1 convs, plain identity residual.
    p_same = _make_params(k1, C_in, C_in, with_proj=False)
    y_same = jax.block_until_ready(conv_block(x, p_same, ch_expand=False))
    assert y_same.shape == (B, C_in, L)
    # Tight check against a reference with identical numerics (bf16 MXU operands,
    # f32 accumulation); loose check against the exact-f32 module semantics.
    _check("same/folded", y_same, _reference_folded(x, p_same, False), 5e-2)
    _check("same/module", y_same, _reference(x, p_same, False), 3e-1)

    # ch_expand=True: stride-2 conv1, doubled channels, 1x1 stride-2 projection.
    p_exp = _make_params(k2, C_in, 2 * C_in, with_proj=True)
    y_exp = jax.block_until_ready(conv_block(x, p_exp, ch_expand=True))
    assert y_exp.shape == (B, 2 * C_in, L // 2)
    _check("expand/folded", y_exp, _reference_folded(x, p_exp, True), 5e-2)
    _check("expand/module", y_exp, _reference(x, p_exp, True), 3e-1)

    # Multi-tile path: exercises the L-tile grid axis + halo indexing (num_l > 1).
    B2, C2, L2 = 2, 8, 384
    x2 = jax.random.normal(k3, (B2, C2, L2), dtype=jnp.float32)
    p2s = _make_params(jax.random.fold_in(k3, 1), C2, C2, with_proj=False)
    y2s = jax.block_until_ready(conv_block(x2, p2s, ch_expand=False, max_tile=128))
    _check("same/tiled", y2s, _reference_folded(x2, p2s, False), 5e-2)
    p2e = _make_params(jax.random.fold_in(k3, 2), C2, 2 * C2, with_proj=True)
    y2e = jax.block_until_ready(conv_block(x2, p2e, ch_expand=True, max_tile=128))
    _check("expand/tiled", y2e, _reference_folded(x2, p2e, True), 5e-2)

    print("KERNEL_OK")
</pallas_src>

<mosaic_0001>
module attributes {stable_mosaic.version = 11 : i64} {
  func.func @_convblock_same_kernel(%arg0: i32, %arg1: i32, %arg2: memref<1x16x16xf32, #tpu.memory_space<vmem>>, %arg3: memref<1x1x16x8xf32, #tpu.memory_space<vmem>>, %arg4: memref<16x80xbf16, #tpu.memory_space<vmem>>, %arg5: memref<16x1xf32, #tpu.memory_space<vmem>>, %arg6: memref<16x80xbf16, #tpu.memory_space<vmem>>, %arg7: memref<16x1xf32, #tpu.memory_space<vmem>>, %arg8: memref<1x16x16xf32, #tpu.memory_space<vmem>>) attributes {dimension_semantics = [#tpu.dimension_semantics<parallel>, #tpu.dimension_semantics<parallel>], iteration_bounds = array<i64: 2, 1>, scalar_prefetch = 0 : i64, scratch_operands = 0 : i64, tpu.core_type = #tpu.core_type<tc>, window_params = [{transform_indices = @transform_0, window_bounds = array<i64: 1, 16, 16>}, {transform_indices = @transform_1, window_bounds = array<i64: 1, 1, 16, 8>}, {pipeline_mode = #tpu.pipeline_mode<synchronous>, transform_indices = @transform_2, window_bounds = array<i64: 16, 80>}, {pipeline_mode = #tpu.pipeline_mode<synchronous>, transform_indices = @transform_3, window_bounds = array<i64: 16, 1>}, {pipeline_mode = #tpu.pipeline_mode<synchronous>, transform_indices = @transform_4, window_bounds = array<i64: 16, 80>}, {pipeline_mode = #tpu.pipeline_mode<synchronous>, transform_indices = @transform_5, window_bounds = array<i64: 16, 1>}, {transform_indices = @transform_6, window_bounds = array<i64: 1, 16, 16>}]} {
    %c0 = arith.constant 0 : index
    %c0_0 = arith.constant 0 : index
    %c0_1 = arith.constant 0 : index
    %0 = vector.load %arg2[%c0, %c0_0, %c0_1] : memref<1x16x16xf32, #tpu.memory_space<vmem>>, vector<1x16x16xf32>
    %1 = vector.shape_cast %0 : vector<1x16x16xf32> to vector<16x16xf32>
    %c0_2 = arith.constant 0 : index
    %c0_3 = arith.constant 0 : index
    %c0_4 = arith.constant 0 : index
    %c0_5 = arith.constant 0 : index
    %2 = vector.load %arg3[%c0_2, %c0_3, %c0_4, %c0_5] : memref<1x1x16x8xf32, #tpu.memory_space<vmem>>, vector<1x1x16x8xf32>
    %3 = vector.shape_cast %2 : vector<1x1x16x8xf32> to vector<16x8xf32>
    %4 = tpu.concatenate %1, %3 in 1 : vector<16x16xf32>, vector<16x8xf32> -> vector<16x24xf32>
    %5 = arith.truncf %4 : vector<16x24xf32> to vector<16x24xbf16>
    %6 = vector.extract_strided_slice %5 {offsets = [0, 0], sizes = [16, 20], strides = [1, 1]} : vector<16x24xbf16> to vector<16x20xbf16>
    %7 = vector.extract_strided_slice %5 {offsets = [0, 1], sizes = [16, 20], strides = [1, 1]} : vector<16x24xbf16> to vector<16x20xbf16>
    %8 = vector.extract_strided_slice %5 {offsets = [0, 2], sizes = [16, 20], strides = [1, 1]} : vector<16x24xbf16> to vector<16x20xbf16>
    %9 = vector.extract_strided_slice %5 {offsets = [0, 3], sizes = [16, 20], strides = [1, 1]} : vector<16x24xbf16> to vector<16x20xbf16>
    %10 = vector.extract_strided_slice %5 {offsets = [0, 4], sizes = [16, 20], strides = [1, 1]} : vector<16x24xbf16> to vector<16x20xbf16>
    %11 = tpu.concatenate %6, %7, %8, %9, %10 in 0 : vector<16x20xbf16>, vector<16x20xbf16>, vector<16x20xbf16>, vector<16x20xbf16>, vector<16x20xbf16> -> vector<80x20xbf16>
    %c0_6 = arith.constant 0 : index
    %c0_7 = arith.constant 0 : index
    %12 = vector.load %arg4[%c0_6, %c0_7] : memref<16x80xbf16, #tpu.memory_space<vmem>>, vector<16x80xbf16>
    %cst = arith.constant dense<0.000000e+00> : vector<16x20xf32>
    %13 = tpu.matmul %12, %11, %cst {dimension_numbers = #tpu.dot_dimension_numbers<[1], [0], [0], [1], [0, 0, 1, 1], [], []>} : vector<16x80xbf16>, vector<80x20xbf16>, vector<16x20xf32> -> vector<16x20xf32>
    %c0_8 = arith.constant 0 : index
    %c0_9 = arith.constant 0 : index
    %14 = vector.load %arg5[%c0_8, %c0_9] : memref<16x1xf32, #tpu.memory_space<vmem>>, vector<16x1xf32>
    %15 = vector.broadcast %14 : vector<16x1xf32> to vector<16x20xf32>
    %16 = arith.addf %13, %15 : vector<16x20xf32>
    %cst_10 = arith.constant 0.000000e+00 : f32
    %cst_11 = arith.constant 6.000000e+00 : f32
    %17 = vector.broadcast %cst_10 : f32 to vector<16x20xf32>
    %18 = arith.maximumf %17, %16 : vector<16x20xf32>
    %19 = vector.broadcast %cst_11 : f32 to vector<16x20xf32>
    %20 = arith.minimumf %19, %18 : vector<16x20xf32>
    %c16_i32 = arith.constant 16 : i32
    %21 = arith.muli %arg1, %c16_i32 : i32
    %c2_i32 = arith.constant 2 : i32
    %22 = arith.subi %21, %c2_i32 : i32
    %23 = tpu.iota {dimensions = array<i32: 1>} : vector<1x20xi32>
    %24 = vector.broadcast %22 : i32 to vector<1x20xi32>
    %25 = arith.addi %24, %23 : vector<1x20xi32>
    %c0_i32 = arith.constant 0 : i32
    %26 = vector.broadcast %c0_i32 : i32 to vector<1x20xi32>
    %27 = arith.cmpi sge, %25, %26 : vector<1x20xi32>
    %c16_i32_12 = arith.constant 16 : i32
    %28 = vector.broadcast %c16_i32_12 : i32 to vector<1x20xi32>
    %29 = arith.cmpi slt, %25, %28 : vector<1x20xi32>
    %30 = arith.andi %27, %29 : vector<1x20xi1>
    %cst_13 = arith.constant 0.000000e+00 : f32
    %31 = vector.shape_cast %30 : vector<1x20xi1> to vector<1x20xi1>
    %32 = vector.broadcast %31 : vector<1x20xi1> to vector<16x20xi1>
    %33 = vector.broadcast %cst_13 : f32 to vector<16x20xf32>
    %34 = arith.select %32, %20, %33 : vector<16x20xi1>, vector<16x20xf32>
    %35 = arith.truncf %34 : vector<16x20xf32> to vector<16x20xbf16>
    %36 = vector.extract_strided_slice %35 {offsets = [0, 0], sizes = [16, 16], strides = [1, 1]} : vector<16x20xbf16> to vector<16x16xbf16>
    %37 = vector.extract_strided_slice %35 {offsets = [0, 1], sizes = [16, 16], strides = [1, 1]} : vector<16x20xbf16> to vector<16x16xbf16>
    %38 = vector.extract_strided_slice %35 {offsets = [0, 2], sizes = [16, 16], strides = [1, 1]} : vector<16x20xbf16> to vector<16x16xbf16>
    %39 = vector.extract_strided_slice %35 {offsets = [0, 3], sizes = [16, 16], strides = [1, 1]} : vector<16x20xbf16> to vector<16x16xbf16>
    %40 = vector.extract_strided_slice %35 {offsets = [0, 4], sizes = [16, 16], strides = [1, 1]} : vector<16x20xbf16> to vector<16x16xbf16>
    %41 = tpu.concatenate %36, %37, %38, %39, %40 in 0 : vector<16x16xbf16>, vector<16x16xbf16>, vector<16x16xbf16>, vector<16x16xbf16>, vector<16x16xbf16> -> vector<80x16xbf16>
    %c0_14 = arith.constant 0 : index
    %c0_15 = arith.constant 0 : index
    %42 = vector.load %arg6[%c0_14, %c0_15] : memref<16x80xbf16, #tpu.memory_space<vmem>>, vector<16x80xbf16>
    %cst_16 = arith.constant dense<0.000000e+00> : vector<16x16xf32>
    %43 = tpu.matmul %42, %41, %cst_16 {dimension_numbers = #tpu.dot_dimension_numbers<[1], [0], [0], [1], [0, 0, 1, 1], [], []>} : vector<16x80xbf16>, vector<80x16xbf16>, vector<16x16xf32> -> vector<16x16xf32>
    %c0_17 = arith.constant 0 : index
    %c0_18 = arith.constant 0 : index
    %44 = vector.load %arg7[%c0_17, %c0_18] : memref<16x1xf32, #tpu.memory_space<vmem>>, vector<16x1xf32>
    %45 = vector.broadcast %44 : vector<16x1xf32> to vector<16x16xf32>
    %46 = arith.addf %43, %45 : vector<16x16xf32>
    %cst_19 = arith.constant 0.000000e+00 : f32
    %cst_20 = arith.constant 6.000000e+00 : f32
    %47 = vector.broadcast %cst_19 : f32 to vector<16x16xf32>
    %48 = arith.maximumf %47, %46 : vector<16x16xf32>
    %49 = vector.broadcast %cst_20 : f32 to vector<16x16xf32>
    %50 = arith.minimumf %49, %48 : vector<16x16xf32>
    %51 = vector.extract_strided_slice %4 {offsets = [0, 4], sizes = [16, 16], strides = [1, 1]} : vector<16x24xf32> to vector<16x16xf32>
    %52 = arith.addf %50, %51 : vector<16x16xf32>
    %c0_21 = arith.constant 0 : index
    %c0_22 = arith.constant 0 : index
    %c0_23 = arith.constant 0 : index
    %53 = vector.load %arg8[%c0_21, %c0_22, %c0_23] : memref<1x16x16xf32, #tpu.memory_space<vmem>>, vector<1x16x16xf32>
    %54 = vector.shape_cast %53 : vector<1x16x16xf32> to vector<16x16xf32>
    %55 = vector.shape_cast %52 : vector<16x16xf32> to vector<1x16x16xf32>
    tpu.vector_store %arg8[%c0_21, %c0_22, %c0_23], %55 {strides = array<i32>} : memref<1x16x16xf32, #tpu.memory_space<vmem>>, vector<1x16x16xf32>,
    return
  }
  func.func @transform_0(%arg0: i32, %arg1: i32) -> (i32, i32, i32) {
    %c0_i32 = arith.constant 0 : i32
    %c0_i32_0 = arith.constant 0 : i32
    return %arg0, %c0_i32, %arg1 : i32, i32, i32
  }
  func.func @transform_1(%arg0: i32, %arg1: i32) -> (i32, i32, i32, i32) {
    %c0_i32 = arith.constant 0 : i32
    %c0_i32_0 = arith.constant 0 : i32
    %c0_i32_1 = arith.constant 0 : i32
    return %arg0, %arg1, %c0_i32, %c0_i32_0 : i32, i32, i32, i32
  }
  func.func @transform_2(%arg0: i32, %arg1: i32) -> (i32, i32) {
    %c0_i32 = arith.constant 0 : i32
    %c0_i32_0 = arith.constant 0 : i32
    %c0_i32_1 = arith.constant 0 : i32
    return %c0_i32, %c0_i32_0 : i32, i32
  }
  func.func @transform_3(%arg0: i32, %arg1: i32) -> (i32, i32) {
    %c0_i32 = arith.constant 0 : i32
    %c0_i32_0 = arith.constant 0 : i32
    %c0_i32_1 = arith.constant 0 : i32
    return %c0_i32, %c0_i32_0 : i32, i32
  }
  func.func @transform_4(%arg0: i32, %arg1: i32) -> (i32, i32) {
    %c0_i32 = arith.constant 0 : i32
    %c0_i32_0 = arith.constant 0 : i32
    %c0_i32_1 = arith.constant 0 : i32
    return %c0_i32, %c0_i32_0 : i32, i32
  }
  func.func @transform_5(%arg0: i32, %arg1: i32) -> (i32, i32) {
    %c0_i32 = arith.constant 0 : i32
    %c0_i32_0 = arith.constant 0 : i32
    %c0_i32_1 = arith.constant 0 : i32
    return %c0_i32, %c0_i32_0 : i32, i32
  }
  func.func @transform_6(%arg0: i32, %arg1: i32) -> (i32, i32, i32) {
    %c0_i32 = arith.constant 0 : i32
    %c0_i32_0 = arith.constant 0 : i32
    return %arg0, %c0_i32, %arg1 : i32, i32, i32
  }
}

</mosaic_0001>

<bundles_post_ra>
// kernel: tpu_custom_call.1
= control target key start
LH: loop header
LB: loop body
LE: loop exit
PB: predicated region body
PF: predicated region fallthrough
CT: control target
= control target key end

     0   :  { %11 = vsyncpa [#allocation3], 0  ;;  %s1059_s0 = inlined_call_operand.vmem [shape: f32[2,16,16], index: 0, kind: input, shape index: {}]   ;;  %s1060_s1 = inlined_call_operand.vmem [shape: f32[2,1,16,8], index: 1, kind: input, shape index: {}]   ;;  %s1061_s2 = inlined_call_operand.vmem [shape: bf16[16,80], index: 2, kind: input, shape index: {}]   ;;  %s1062_s3 = inlined_call_operand.vmem [shape: f32[16,1], index: 3, kind: input, shape index: {}]   ;;  %s1063_s4 = inlined_call_operand.vmem [shape: bf16[16,80], index: 4, kind: input, shape index: {}]   ;;  %s1064_s5 = inlined_call_operand.vmem [shape: f32[16,1], index: 5, kind: input, shape index: {}]   ;;  %s1065_s6 = inlined_call_operand.hbm [shape: f32[2,16,16], index: 6, kind: output, shape index: {}]  }
   0x1   :  { %13 = vsyncpa [#allocation3 + $0x1], 0  ;;  %s887_s21 = smov 0   ;;  %s889_s22 = smov 0  }
   0x2   :  { %s891_s23 = smov 0   ;;  %s893_s24 = smov 0  }
   0x3   :  { %s895_s25 = smov 0   ;;  %s897_s26 = smov 0  }
   0x4 LB: > { %s627_s27 = sadd.s32 4294967295, %s839_s26   ;;  %s628_s28 = sadd.s32 4294967294, %s839_s26   ;;  %s839_s26 = sphi %s897_s26, %s19_s26   ;;  %s835_s25 = sphi %s895_s25, %s1072_s25   ;;  %s831_s24 = sphi %s893_s24, %s1071_s24   ;;  %s827_s23 = sphi %s891_s23, %s1070_s23   ;;  %s823_s22 = sphi %s889_s22, %s1069_s22   ;;  %s819_s21 = sphi %s887_s21, %s1068_s21  }
   0x5   : > { %s31_s29 = sadd.s32 1, %s835_s25  ;;  %s180_s30 = sadd.s32 1, %s827_s23 }
   0x6   : > { %p33_p0 = scmp.ge.s32.totalorder %s31_s29, 2  ;;  %p190_p1 = scmp.ne.s32.totalorder %s827_s23, %s823_s22 }
   0x7   : > { %p191_p2 = scmp.eq.s32.totalorder %s627_s27, 1  ;;  %p196_p3 = scmp.ne.s32.totalorder %s823_s22, %s819_s21 }
   0x8   : > { %s1074_s29 = smov (%p33_p0, %s31_s29), 0  ;;  %p197_p5 = scmp.eq.s32.totalorder %s628_s28, 1 }
   0x9   : > { %p927_p4 = por %p191_p2, %p190_p1  ;;  %s175_s8 = ssub.s32 %s835_s25, %s1074_s29 }
   0xa   : > { %p631_p6 = scmp.ge.s32.totalorder %s839_s26, 1  ;;  %p178_p7 = scmp.eq.s32.totalorder %s175_s8, 0 }
   0xb   : > { %p934_p8 = por %p197_p5, %p196_p3  ;;  %p250_p9 = scmp.lt.s32.totalorder %s839_s26, 3 }
   0xc   : > { %s940_s10 = scalar_select %p178_p7, %s827_s23, %s180_s30  }
   0xd   : > { %p251_p10 = pnand %p631_p6, %p250_p9 }
   0xe   : > { %p292_p11 = scmp.lt.s32.totalorder (!%p251_p10), %s831_s24, 1  ;;  %v841_v0 = vmov (!%p251_p10), 0.0   ;;  %s842_s16 = smov (!%p251_p10), 16   ;;  %vm322_vm0 = vcmask (!%p251_p10), 130048   ;;  %vm845_vm1 = vmmov (!%p251_p10), 0   ;;  %v341_v10 = vld [vmem:[%s1062_s3] sm:$0xff] (!%p251_p10)  ;;  %v409_v18 = vlaneseq (!%p251_p10) }
   0xf   : > { %254 = sbr.rel (%p251_p10) target bundleno = 869 (0x365), region = 44  ;;  %664 = vmatprep.subr.bf16.mxu0 (!%p251_p10), %v841_v0  ;;  %678 = vmatprep.subr.bf16.mxu1 (!%p251_p10), %v841_v0  ;;  %s843_s20 = smov (!%p251_p10), 125   ;;  %v846_v11 = vmov (!%p251_p10), 0   ;;  %v342_v12 = vld [vmem:[%s1062_s3 + $0x8] sm:$0xff] (!%p251_p10)  ;;  %v759_v17 = vld [vmem:[%s1061_s2] sm:$0xff] (!%p251_p10)   ;;  %vm358_vm2 = vcmask (!%p251_p10), 654336  }
  0x10   : > { %s844_s27 = smov (!%p251_p10), 127   ;;  %674 = vmatprep.mubr.msk.bf16.mxu0 (!%p251_p10), %vm845_vm1, %v841_v0  ;;  %688 = vmatprep.mubr.msk.bf16.mxu1 (!%p251_p10), %vm845_vm1, %v841_v0  ;;  %s847_s8 = smov (!%p251_p10), 126   ;;  %v410_v19 = vand.u32 (!%p251_p10), 127, %v409_v18  ;;  %v437_v37 = vld [vmem:[%s1064_s5 + $0x8] sm:$0xff] (!%p251_p10)  ;;  %v436_v38 = vld [vmem:[%s1064_s5] sm:$0xff] (!%p251_p10) }
  0x11   : > { %757 = vset.pattern.permute.xlu0 (!%p251_p10), %v846_v11  ;;  %758 = vset.pattern.permute.xlu1 (!%p251_p10), %v846_v11  ;;  %v760_v43 = vld [vmem:[%s1063_s4] sm:$0xff] (!%p251_p10)   ;;  %s289_s28 = sand.u32 (!%p251_p10), 1, %s823_s22   ;;  %s849_s17 = smov (!%p251_p10), [#allocation2]  }
  0x12   : > { %v412_v21 = vadd.s32 (!%p251_p10), 4294967294, %v410_v19  ;;  %s632_s30 = sshll.u32 (!%p251_p10), %s289_s28, 4  ;;  %s765_s18 = sshll.u32 (!%p251_p10), %s849_s17, 4  ;;  %s766_s18 = int_to_ptr.vmem [resolvable:$false] %s765_s18 }
  0x14   : > { %vm413_vm3 = vcmp.ge.s32.totalorder (!%p251_p10), %v412_v21, 0  ;;  %vm414_vm4 = vcmp.lt.s32.totalorder (!%p251_p10), %v412_v21, 16 }
  0x15   : > { %vm415_vm5 = vmand (!%p251_p10), %vm413_vm3, %vm414_vm4 }
  0x16   : > { %s293_s11 = scalar_select %p292_p11, %s831_s24, 1  ;;  %vm640_vm6 = vmpackc.low %vm415_vm5, %vm415_vm5 }
  0x18   : > { %s649_s12 = sshll.u32 %s293_s11, 4  ;;  %s848_s11 = smov 124  }
  0x19   : > { %s308_s15 = scalar_lea.vmem %s1060_s1, %s649_s12  ;;  %s299_s19 = scalar_lea.vmem %s1059_s0, %s649_s12 }
  0x1a   : > { %v312_v1 = vld [vmem:[%s308_s15] sm:$0xff]  ;;  %v313_v2 = vld [vmem:[%s308_s15 + $0x8] sm:$0xff] }
  0x1b   : > { %316 = vrot.lane.b32.xlu0 %v312_v1, %s842_s16  ;;  %v310_v4 = vld [vmem:[%s299_s19] sm:$0xff]  ;;  %v311_v5 = vld [vmem:[%s299_s19 + $0x8] sm:$0xff]  ;;  %s767_s19 = scalar_lea.vmem %s766_s18, 512 }
  0x1f   : > { %318 = vrot.lane.b32.xlu0 %v313_v2, %s842_s16 }
  0x8d   : > { %v317_v3 = vpop.permute.xlu0 %316 }
  0x8e   : > { %v953_v7 = vsel %vm322_vm0, %v310_v4, %v317_v3 }
  0x91   : > { %v319_v6 = vpop.permute.xlu0 %318 }
  0x92   : > { %v956_v8 = vsel %vm322_vm0, %v311_v5, %v319_v6 }
  0x93   : > { %v325_v9 = vpack.c.bf16 %v956_v8, %v953_v7 }
  0x95   : > { %333 = vrot.lane.b32.xlu0 %v325_v9, %s843_s20  ;;  %327 = vrot.lane.b32.xlu1 %v325_v9, %s844_s27 }
  0x96   : > { %665 = vmatpush3.bf16.msra.mxu0 %v325_v9 }
  0x97   : > { %666 = vmatprep.subr.bf16.mxu0 %v841_v0 }
  0x99   : > { %330 = vrot.lane.b32.xlu1 %v325_v9, %s847_s8  ;;  %345 = vperm.xlu0 %757, %v341_v10  }
  0x9d   : > { %336 = vrot.lane.b32.xlu1 %v325_v9, %s848_s11 }
  0xa1   : > { %350 = vperm.xlu1 %758, %v342_v12  }
 0x107   : > { %v328_v13 = vpop.permute.xlu1 %327  ;;  %v334_v15 = vpop.permute.xlu0 %333 }
 0x108   : > { %667 = vmatpush3.bf16.msra.mxu0 %v328_v13 }
 0x109   : > { %668 = vmatprep.subr.bf16.mxu0 %v841_v0 }
 0x10b   : > { %v331_v14 = vpop.permute.xlu1 %330 }
 0x10c   : > { %669 = vmatpush3.bf16.msra.mxu0 %v331_v14 }
 0x10d   : > { %670 = vmatprep.subr.bf16.mxu0 %v841_v0 }
 0x10f   : > { %v337_v16 = vpop.permute.xlu1 %336 }
 0x110   : > { %671 = vmatpush3.bf16.msra.mxu0 %v334_v15 }
 0x111   : > { %672 = vmatprep.subr.bf16.mxu0 %v841_v0 }
 0x114   : > { %673 = vmatpush3.bf16.msra.mxu0 %v337_v16 }
 0x117   : > { %675 = vmatmul.mubr.msk.bf16.vlgmr.msra.gmra.mrb[0].mxu0 %vm358_vm2, %v759_v17 }
 0x118   : > { %v346_v20 = vpop.permute.xlu0 %345 }
 0x120   : > { %v351_v23 = vpop.permute.xlu1 %350 }
 0x1ea   : > { %v396_v22 = vpop.f32.mrb[0].mxu0 }
 0x1eb   : > { %v397_v24 = vadd.f32 %v396_v22, %v346_v20  ;;  %v676_v25 = vpop.f32.mrb[1].mxu0 }
 0x1ec   : > { %v399_v26 = vpop.f32.mrb[2].mxu0 }
 0x1ed   : > { %v403_v27 = vmax.f32 %v397_v24, 0.0  ;;  %v400_v28 = vadd.f32 %v399_v26, %v351_v23  ;;  %v677_v29 = vpop.f32.mrb[3].mxu0 }
 0x1ef   : > { %v405_v30 = vmin.f32 %v403_v27, 6.0  ;;  %v404_v31 = vmax.f32 %v400_v28, 0.0 }
 0x1f1   : > { %v406_v32 = vmin.f32 %v404_v31, 6.0  ;;  %v418_v33 = vsel %vm415_vm5, %v405_v30, 0.0 }
 0x1f3   : > { %v419_v34 = vsel %vm415_vm5, %v406_v32, 0.0  ;;  %v641_v35 = vpack.c.bf16 %v406_v32, %v405_v30 }
 0x1f4   : > { %v420_v36 = vpack.c.bf16 %v419_v34, %v418_v33 }
 0x1f5   : > { %679 = vmatpush3.bf16.msk.msra.mxu1 %vm640_vm6, %v641_v35 }
 0x1f6   : > { %425 = vrot.lane.b32.xlu0 %v420_v36, %s847_s8  ;;  %422 = vrot.lane.b32.xlu1 %v420_v36, %s844_s27  ;;  %s651_s8 = sshll.u32 %s831_s24, 8  ;;  %s1013_s24 = scalar_lea.sflag [#allocation3], %s289_s28 }
 0x1f7   : > { %680 = vmatprep.subr.bf16.mxu1 %v841_v0  ;;  %s1007_s15 = scalar_lea.hbm %s1065_s6, %s651_s8 }
 0x1fa   : > { %431 = vrot.lane.b32.xlu0 %v420_v36, %s848_s11  ;;  %428 = vrot.lane.b32.xlu1 %v420_v36, %s843_s20 }
 0x1fe   : > { %445 = vperm.xlu0 %757, %v437_v37   ;;  %440 = vperm.xlu1 %758, %v436_v38  }
 0x202   : > { %505 = vrot.lane.b32.xlu0 %v956_v8, %s848_s11  ;;  %503 = vrot.lane.b32.xlu1 %v953_v7, %s848_s11  ;;  %s291_s11 = scalar_lea.vmem [#allocation2], %s632_s30 }
 0x203   : > { %s528_s12 = sshll.u32 %s291_s11, 4  ;;  %s1009_s12 = int_to_ptr.vmem [resolvable:$true] %s528_s12 }
 0x204   : > { %s761_s16 = scalar_lea.vmem %s1009_s12, 256  ;;  %p768_p1 = scmp.lt.s32.totalorder %s1009_s12, %s766_s18 }
 0x205   : > { %p762_p12 = scmp.ne.s32.totalorder %s1009_s12, %s761_s16  ;;  %p769_p2 = scmp.lt.s32.totalorder %s767_s19, %s761_s16 }
 0x207   : > { %p763_p13 = pnand %p762_p12, %p927_p4  ;;  %p770_p3 = por %p769_p2, %p768_p1 }
 0x209   : > { %p764_p0 = pneg %p763_p13 }
 0x20b   : > { %p771_p5 = pnand %p770_p3, %p764_p0 }
 0x268   : > { %v423_v39 = vpop.permute.xlu1 %422  ;;  %v426_v40 = vpop.permute.xlu0 %425 }
 0x269   : > { %681 = vmatpush3.bf16.msra.mxu1 %v423_v39 }
 0x26a   : > { %682 = vmatprep.subr.bf16.mxu1 %v841_v0 }
 0x26c   : > { %v429_v41 = vpop.permute.xlu1 %428  ;;  %v432_v42 = vpop.permute.xlu0 %431 }
 0x26d   : > { %683 = vmatpush3.bf16.msra.mxu1 %v426_v40 }
 0x26e   : > { %684 = vmatprep.subr.bf16.mxu1 %v841_v0 }
 0x271   : > { %685 = vmatpush3.bf16.msra.mxu1 %v429_v41 }
 0x272   : > { %686 = vmatprep.subr.bf16.mxu1 %v841_v0 }
 0x275   : > { %687 = vmatpush3.bf16.msra.mxu1 %v432_v42 }
 0x278   : > { %689 = vmatmul.mubr.msk.bf16.vlgmr.msra.gmra.mrb[0].mxu1 %vm358_vm2, %v760_v43 }
 0x27d   : > { %v441_v44 = vpop.permute.xlu1 %440  ;;  %v446_v48 = vpop.permute.xlu0 %445 }
 0x281   : > { %v504_v55 = vpop.permute.xlu1 %503  ;;  %v506_v58 = vpop.permute.xlu0 %505 }
 0x34b   : > { %v490_v45 = vpop.f32.mrb[0].mxu1 }
 0x34c   : > { %v491_v46 = vadd.f32 %v490_v45, %v441_v44  ;;  %v690_v47 = vpop.f32.mrb[1].mxu1 }
 0x34d   : > { %v493_v49 = vpop.f32.mrb[2].mxu1 }
 0x34e   : > { %v497_v50 = vmax.f32 %v491_v46, 0.0  ;;  %v494_v51 = vadd.f32 %v493_v49, %v446_v48  ;;  %v691_v52 = vpop.f32.mrb[3].mxu1 }
 0x350   : > { %v499_v53 = vmin.f32 %v497_v50, 6.0  ;;  %v498_v54 = vmax.f32 %v494_v51, 0.0 }
 0x352   : > { %v509_v56 = vadd.f32 %v504_v55, %v499_v53  ;;  %v500_v57 = vmin.f32 %v498_v54, 6.0 }
 0x354   : > { %511 = vst.msk [vmem:[%s291_s11] sm:$0xff] %vm322_vm0, %v509_v56  ;;  %v510_v59 = vadd.f32 %v506_v58, %v500_v57 }
 0x356   : > { %512 = vst.msk [vmem:[%s291_s11 + $0x8] sm:$0xff] %vm322_vm0, %v510_v59 }
 0x357   : > { %774 = shalt.err (!%p771_p5)
}
 0x358   : > { %s775_s20 = scalar_lea.hbm %s1007_s15, 256  ;;  %s779_s30 = scalar_lea.hbm %s1065_s6, 512 }
 0x359   : > { %p776_p6 = scmp.ne.s32.totalorder %s1007_s15, %s775_s20  ;;  %p780_p10 = scmp.lt.u32.totalorder %s1007_s15, %s1065_s6 }
 0x35a   : > { %p781_p11 = scmp.lt.u32.totalorder %s779_s30, %s775_s20  ;;  %p783_p13 = scmp.lt.u32.totalorder %s775_s20, %s1007_s15 }
 0x35b   : > { %p777_p7 = pnand %p776_p6, %p927_p4 }
 0x35c   : > { %p782_p12 = por %p781_p11, %p780_p10 }
 0x35d   : > { %p778_p9 = pneg %p777_p7 }
 0x35e   : > { %p784_p0 = por %p783_p13, %p782_p12 }
 0x360   : > { %p785_p1 = pnand %p784_p0, %p778_p9 }
 0x362   : > { %788 = shalt.err (!%p785_p1)
}
 0x363   : > { %s850_s13 = smov 128   ;;  %s851_s14 = smov 8  }
 0x364   : > { %692 = dma.vmem_to_hbm [thread:$0]  (%p927_p4), %s1009_s12, 256, %s1007_s15, %s1013_s24, %s850_s13, %s850_s13, %s851_s14  }
 0x365 PF: > { %p698_p2 = scmp.ge.s32.totalorder %s839_s26, 2  ;;  %s543_s16 = sand.u32 1, %s819_s21  }
 0x366   : > { %s544_s17 = scalar_lea.sflag [#allocation3], %s543_s16 }
 0x367   : > { %p695_p3 = pnand %p698_p2, %p934_p8 }
 0x369   : > { %814 = dma.done.wait (!%p695_p3), %s544_s17, 256  }
 0x36a   : > { %816 = vsyncadd (!%p695_p3), %s544_s17, 4294967040  ;;  %s19_s26 = sadd.s32 1, %s839_s26   ;;  %s1068_s21 = smov %s823_s22 }
 0x36b   : > { %p16_p5 = scmp.ge.s32.totalorder %s19_s26, 4   ;;  %s1069_s22 = smov %s827_s23 }
 0x36c   : > { %s1070_s23 = smov %s940_s10  ;;  %s1071_s24 = smov %s835_s25 }
 0x36d   : > { %s1072_s25 = smov %s1074_s29  ;;  %18 = sbr.rel (!%p16_p5) target bundleno = 4 (0x4), region = 82 }
 0x374   :  { %549 = vsyncpa [#allocation3], 1 }
 0x375   :  { %551 = vsyncpa [#allocation3 + $0x1], 1 }

</bundles_post_ra>
